<compile_context>
chip_gen: v5e
topology: v5e:2x2
jax: 0.10.0
libtpu: 0.0.40
codegen_flags: <defaults>
</compile_context>

<pallas_src>
import numpy as np
import jax
import jax.numpy as jnp
from jax.experimental import pallas as pl
from jax.experimental.pallas import tpu as pltpu

# ---------------- static geometry (baked into the precomputed matrix) ----------------
B = 2                     # batch
A = 8                     # number of projections
D = 32                    # detector bins
H = W = 16                # reconstructed volume shape
VOL_SPACING = 1.0
DET_SPACING = 1.0
VOL_ORIGIN_X = -(W - 1) / 2.0 * VOL_SPACING
VOL_ORIGIN_Y = -(H - 1) / 2.0 * VOL_SPACING
DET_ORIGIN = -(D - 1) / 2.0 * DET_SPACING
ANGULAR_RANGE = np.pi
ANGLES = np.arange(A, dtype=np.float64) * (ANGULAR_RANGE / A)


def make_filter_and_reco_matrix():
    """Ram-Lak (ramp) complex filter (the nn.Parameter(cfloat) of the module) plus the
    fused real reconstruction matrix G = circulant(Re(ifft(filter))) ∘ backprojection."""
    freqs = np.fft.fftfreq(D)
    filt_c = (2.0 * np.abs(freqs)).astype(np.complex64)          # (D,) complex filter param

    # ifft_ortho(fft_ortho(x) * F) == ifft(fft(x) * F) (ortho 1/sqrt(D) factors cancel);
    # for real x, taking .real commutes with the real-weighted angle sum, so filtering a
    # real sinogram with ANY complex F is exactly circular convolution with Re(ifft(F)).
    h = np.real(np.fft.ifft(filt_c.astype(np.complex128)))       # spatial kernel (D,)
    idx = (np.arange(D)[None, :] - np.arange(D)[:, None]) % D    # Ct[m, n] = h[(n-m) % D]
    Ct = h[idx]                                                  # filtered_row = row @ Ct

    # Parallel-beam backprojection linear-interpolation weights (static geometry).
    cosv, sinv = np.cos(ANGLES), np.sin(ANGLES)
    ix, iy = np.meshgrid(np.arange(W, dtype=np.float64), np.arange(H, dtype=np.float64))
    wx = ix * VOL_SPACING + VOL_ORIGIN_X
    wy = iy * VOL_SPACING + VOL_ORIGIN_Y
    det = (wx[None] * cosv[:, None, None] + wy[None] * sinv[:, None, None]
           - DET_ORIGIN) / DET_SPACING                           # (A, H, W)
    dd = np.arange(D, dtype=np.float64)
    wgt = np.maximum(0.0, 1.0 - np.abs(dd[None, None, None, :] - det[..., None]))
    valid = ((det >= 0.0) & (det <= D - 1))[..., None]
    wgt = (wgt * valid).reshape(A, H * W, D)                     # (A, HW, D)

    # Fold the filter circulant into the backprojection weights:
    #   G[(a, d'), hw] = sum_d Ct[d', d] * wgt[a, hw, d]
    G = np.einsum("pd,ahd->aph", Ct, wgt).reshape(A * D, H * W)
    # TODO(synk): pyronn's CUDA backprojector may fold an extra pi/num_projections
    # normalization into the op; the plain angle-sum backprojection is used here.
    return filt_c, G.astype(np.float32)


# --------------------------------- Pallas kernel ------------------------------------
def fbp_kernel(sino_ref, g_ref, out_ref):
    # sino_ref: (B, A*D) VMEM    g_ref: (A*D, H*W) VMEM    out_ref: (B, H*W) VMEM
    # Entire FBP = one lane-dense MXU matmul; output last dim 256 = 2 full 128-lane
    # vregs -> unmasked vst stores; f32 accumulation on the MXU.
    out_ref[...] = jnp.dot(
        sino_ref[...], g_ref[...],
        precision=jax.lax.Precision.HIGHEST,
        preferred_element_type=jnp.float32,
    )


def parallel_beam_reconstruction_2d(sino, G):
    """sino: (B, A, D) float32 sinogram, G: (A*D, H*W) fused reco matrix -> (B, H, W)."""
    bn = sino.shape[0]
    sino_flat = sino.reshape(bn, A * D)                          # lane-dense input layout
    out_flat = pl.pallas_call(
        fbp_kernel,
        out_shape=jax.ShapeDtypeStruct((bn, H * W), jnp.float32),
        grid_spec=pltpu.PrefetchScalarGridSpec(
            num_scalar_prefetch=0,
            grid=(1,),                                           # single step: whole batch at once
            in_specs=[
                pl.BlockSpec((bn, A * D), lambda i: (0, 0)),
                pl.BlockSpec((A * D, H * W), lambda i: (0, 0)),
            ],
            out_specs=pl.BlockSpec((bn, H * W), lambda i: (0, 0)),
        ),
        compiler_params=pltpu.CompilerParams(
            dimension_semantics=("arbitrary",),
        ),
    )(sino_flat, G)
    return out_flat.reshape(bn, H, W)                            # lane-dense out, reshape outside


# -------------------------------- reference (plain numpy) ---------------------------
def reference_fbp(sino_np, filt_c):
    x = np.fft.fft(np.asarray(sino_np, dtype=np.float64), axis=-1, norm="ortho")
    x = x * filt_c.astype(np.complex128)
    x = np.real(np.fft.ifft(x, axis=-1, norm="ortho"))                       # (B, A, D)

    cosv, sinv = np.cos(ANGLES), np.sin(ANGLES)
    ix, iy = np.meshgrid(np.arange(W), np.arange(H))                          # (H, W) each
    wx = ix * VOL_SPACING + VOL_ORIGIN_X
    wy = iy * VOL_SPACING + VOL_ORIGIN_Y
    det = (wx[None] * cosv[:, None, None] + wy[None] * sinv[:, None, None]
           - DET_ORIGIN) / DET_SPACING                                        # (A, H, W)
    dd = np.arange(D)
    wgt = np.maximum(0.0, 1.0 - np.abs(dd[None, None, None, :] - det[..., None]))
    valid = ((det >= 0.0) & (det <= D - 1))[..., None]
    wgt = wgt * valid
    return np.einsum("ahwd,bad->bhw", wgt, x)


if __name__ == "__main__":
    key = jax.random.PRNGKey(0)
    sino = jax.random.normal(key, (B, A, D), dtype=jnp.float32)

    filt_c, G = make_filter_and_reco_matrix()

    out = parallel_beam_reconstruction_2d(sino, jnp.asarray(G))
    out = jax.block_until_ready(out)

    ref = reference_fbp(np.asarray(sino), filt_c)
    assert out.shape == (B, H, W) and out.dtype == jnp.float32
    assert np.allclose(np.asarray(out), ref, atol=2e-2, rtol=2e-2), "mismatch vs reference"

    print("KERNEL_OK")
</pallas_src>

<mosaic_0001>
module attributes {stable_mosaic.version = 11 : i64} {
  func.func @fbp_kernel(%arg0: i32, %arg1: memref<2x256xf32, #tpu.memory_space<vmem>>, %arg2: memref<256x256xf32, #tpu.memory_space<vmem>>, %arg3: memref<2x256xf32, #tpu.memory_space<vmem>>) attributes {dimension_semantics = [#tpu.dimension_semantics<arbitrary>], iteration_bounds = array<i64: 1>, scalar_prefetch = 0 : i64, scratch_operands = 0 : i64, tpu.core_type = #tpu.core_type<tc>, window_params = [{pipeline_mode = #tpu.pipeline_mode<synchronous>, transform_indices = @transform_0, window_bounds = array<i64: 2, 256>}, {pipeline_mode = #tpu.pipeline_mode<synchronous>, transform_indices = @transform_1, window_bounds = array<i64: 256, 256>}, {pipeline_mode = #tpu.pipeline_mode<synchronous>, transform_indices = @transform_2, window_bounds = array<i64: 2, 256>}]} {
    %c0 = arith.constant 0 : index
    %c0_0 = arith.constant 0 : index
    %0 = vector.load %arg1[%c0, %c0_0] : memref<2x256xf32, #tpu.memory_space<vmem>>, vector<2x256xf32>
    %c0_1 = arith.constant 0 : index
    %c0_2 = arith.constant 0 : index
    %1 = vector.load %arg2[%c0_1, %c0_2] : memref<256x256xf32, #tpu.memory_space<vmem>>, vector<256x256xf32>
    %cst = arith.constant dense<0.000000e+00> : vector<2x256xf32>
    %2 = tpu.matmul %0, %1, %cst {dimension_numbers = #tpu.dot_dimension_numbers<[1], [0], [0], [1], [0, 0, 1, 1], [], []>, precision = #tpu.contract_precision<fp32>} : vector<2x256xf32>, vector<256x256xf32>, vector<2x256xf32> -> vector<2x256xf32>
    %c0_3 = arith.constant 0 : index
    %c0_4 = arith.constant 0 : index
    %3 = vector.load %arg3[%c0_3, %c0_4] : memref<2x256xf32, #tpu.memory_space<vmem>>, vector<2x256xf32>
    tpu.vector_store %arg3[%c0_3, %c0_4], %2 {strides = array<i32>} : memref<2x256xf32, #tpu.memory_space<vmem>>, vector<2x256xf32>,
    return
  }
  func.func @transform_0(%arg0: i32) -> (i32, i32) {
    %c0_i32 = arith.constant 0 : i32
    %c0_i32_0 = arith.constant 0 : i32
    %c0_i32_1 = arith.constant 0 : i32
    return %c0_i32, %c0_i32_0 : i32, i32
  }
  func.func @transform_1(%arg0: i32) -> (i32, i32) {
    %c0_i32 = arith.constant 0 : i32
    %c0_i32_0 = arith.constant 0 : i32
    %c0_i32_1 = arith.constant 0 : i32
    return %c0_i32, %c0_i32_0 : i32, i32
  }
  func.func @transform_2(%arg0: i32) -> (i32, i32) {
    %c0_i32 = arith.constant 0 : i32
    %c0_i32_0 = arith.constant 0 : i32
    %c0_i32_1 = arith.constant 0 : i32
    return %c0_i32, %c0_i32_0 : i32, i32
  }
}

</mosaic_0001>

<bundles_post_ra>
// kernel: tpu_custom_call.1
= control target key start
LH: loop header
LB: loop body
LE: loop exit
PB: predicated region body
PF: predicated region fallthrough
CT: control target
= control target key end

     0   :  { %7 = vsyncpa [#allocation3], 0  ;;  %s2622_s0 = inlined_call_operand.hbm [shape: f32[2,256], index: 0, kind: input, shape index: {}]   ;;  %s2623_s1 = inlined_call_operand.hbm [shape: f32[256,256], index: 1, kind: input, shape index: {}]   ;;  %s2624_s2 = inlined_call_operand.hbm [shape: f32[2,256], index: 2, kind: output, shape index: {}]  }
   0x1   :  { %8 = vsyncpa [#allocation6], 0 }
   0x2   :  { %9 = vsyncpa [#allocation4], 0  ;;  %s15_s11 = sshll.u32 %s2622_s0, 4  ;;  %s1585_s12 = smov [#allocation2]   ;;  %s16_s11 = int_to_ptr.hbm [resolvable:$true] %s15_s11 }
   0x3   :  { %s17_s13 = sshll.u32 %s1585_s12, 4  ;;  %s25_s16 = sshll.u32 %s2623_s1, 4  ;;  %s18_s13 = int_to_ptr.vmem [resolvable:$true] %s17_s13  ;;  %s26_s16 = int_to_ptr.hbm [resolvable:$true] %s25_s16 }
   0x4   :  { %20 = dma.hbm_to_vmem [thread:$0]  %s16_s11, 64, %s18_s13, [#allocation3]  }
   0x5   :  { %s1586_s17 = smov [#allocation5]   ;;  %s1587_s19 = smov 256  }
   0x6   :  { %s27_s18 = sshll.u32 %s1586_s17, 4  ;;  %s1588_s20 = smov 16   ;;  %s28_s18 = int_to_ptr.vmem [resolvable:$true] %s27_s18 }
   0x7   :  { %33 = dma.hbm_to_vmem [thread:$0]  %s26_s16, 8192, %s28_s18, [#allocation6], %s1587_s19, %s1587_s19, %s1588_s20  }
   0x8   :  { %1579 = dma.done.wait [#allocation3], 64  }
   0x9   :  { %1580 = vsyncadd [#allocation3], 4294967232 }
   0xa   :  { %1581 = dma.done.wait [#allocation6], 8192  }
   0xb   :  { %1582 = vsyncadd [#allocation6], 4294959104  ;;  %v73_v0 = vld [vmem:[#allocation5 + $0xf0] sm:$0xff]  ;;  %v71_v1 = vld [vmem:[#allocation5 + $0xe0] sm:$0xff]  ;;  %s1589_s0 = smov [#allocation7]   ;;  %s1491_s23 = sshll.u32 %s2624_s2, 4  ;;  %s1492_s23 = int_to_ptr.hbm [resolvable:$true] %s1491_s23 }
   0xc   :  { %v69_v2 = vld [vmem:[#allocation5 + $0xd0] sm:$0xff]  ;;  %v1611_v3 = vand.u32 4294901760, %v73_v0  ;;  %v1613_v4 = vand.u32 4294901760, %v71_v1  ;;  %v67_v6 = vld [vmem:[#allocation5 + $0xc0] sm:$0xff]  ;;  %v42_v55 = vld [vmem:[#allocation2] sm:$0xf] }
   0xd   :  { %v1615_v5 = vand.u32 4294901760, %v69_v2  ;;  %v65_v7 = vld [vmem:[#allocation5 + $0xb0] sm:$0xff]  ;;  %v63_v8 = vld [vmem:[#allocation5 + $0xa0] sm:$0xff]  ;;  %v1617_v9 = vand.u32 4294901760, %v67_v6  ;;  %108 = vst [vmem:[#allocation1] ss:$4 sm:$0xff] %v42_v55 }
   0xe   :  { %v1619_v10 = vand.u32 4294901760, %v65_v7  ;;  %v1621_v11 = vand.u32 4294901760, %v63_v8  ;;  %v61_v12 = vld [vmem:[#allocation5 + $0x90] sm:$0xff]  ;;  %v59_v13 = vld [vmem:[#allocation5 + $0x80] sm:$0xff]  ;;  %114 = vmatpush.msra.mxu0 %v1611_v3  ;;  %v1625_v14 = vsub.f32 %v73_v0, %v1611_v3  ;;  %v1628_v15 = vsub.f32 %v71_v1, %v1613_v4  ;;  %310 = vmatpush.msra.mxu3 %v1611_v3  ;;  %s1489_s1 = sshll.u32 %s1589_s0, 4  ;;  %s1490_s1 = int_to_ptr.vmem [resolvable:$true] %s1489_s1 }
   0xf   :  { %v1632_v16 = vsub.f32 %v69_v2, %v1615_v5  ;;  %v1634_v17 = vand.u32 4294901760, %v61_v12  ;;  %v57_v18 = vld [vmem:[#allocation5 + $0x70] sm:$0xff]  ;;  %v1637_v19 = vsub.f32 %v67_v6, %v1617_v9  ;;  %v1650_v25 = vand.u32 4294901760, %v59_v13  ;;  %v55_v26 = vld [vmem:[#allocation5 + $0x60] sm:$0xff] }
  0x10   :  { %v1640_v20 = vsub.f32 %v65_v7, %v1619_v10  ;;  %v1643_v21 = vsub.f32 %v63_v8, %v1621_v11  ;;  %116 = vmatpush.msra.mxu0 %v1613_v4  ;;  %257 = vmatpush.msra.mxu2 %v1625_v14  ;;  %v156_v22 = vand.u32 4294901760, %v1625_v14  ;;  %v2640_v23 = vand.u32 4294901760, %v1628_v15  ;;  %v53_v34 = vld [vmem:[#allocation5 + $0x50] sm:$0xff]  ;;  %v51_v42 = vld [vmem:[#allocation5 + $0x40] sm:$0xff] }
  0x11   :  { %v2638_v24 = vand.u32 4294901760, %v1632_v16  ;;  %312 = vmatpush.msra.mxu3 %v1613_v4  ;;  %v2636_v27 = vand.u32 4294901760, %v1637_v19  ;;  %v1654_v28 = vand.u32 4294901760, %v57_v18  ;;  %v1657_v29 = vsub.f32 %v61_v12, %v1634_v17  ;;  %v49_v48 = vld [vmem:[#allocation5 + $0x30] sm:$0xff]  ;;  %v47_v54 = vld [vmem:[#allocation5 + $0x20] sm:$0xff] }
  0x12   :  { %118 = vmatpush.msra.mxu0 %v1615_v5  ;;  %260 = vmatpush.msra.mxu2 %v1628_v15  ;;  %v157_v30 = vsub.f32 %v1625_v14, %v156_v22  ;;  %v163_v31 = vsub.f32 %v1628_v15, %v2640_v23  ;;  %v2634_v33 = vand.u32 4294901760, %v1640_v20  ;;  %v1672_v35 = vand.u32 4294901760, %v55_v26  ;;  %v105_v60 = vld [vmem:[#allocation5 + $0x1f0] sm:$0xff]  ;;  %v43_v6 = vld [vmem:[#allocation5] sm:$0xff] }
  0x13   :  { %v169_v32 = vsub.f32 %v1632_v16, %v2638_v24  ;;  %314 = vmatpush.msra.mxu3 %v1615_v5  ;;  %v2632_v36 = vand.u32 4294901760, %v1643_v21  ;;  %v175_v39 = vsub.f32 %v1637_v19, %v2636_v27  ;;  %v1681_v40 = vsub.f32 %v59_v13, %v1650_v25  ;;  %v45_v62 = vld [vmem:[#allocation5 + $0x10] sm:$0xff]  ;;  %v103_v7 = vld [vmem:[#allocation5 + $0x1e0] sm:$0xff] }
  0x14   :  { %120 = vmatpush.msra.mxu0 %v1617_v9  ;;  %v158_v37 = vand.u32 4294901760, %v157_v30  ;;  %263 = vmatpush.msra.mxu2 %v1632_v16  ;;  %v164_v38 = vand.u32 4294901760, %v163_v31  ;;  %v1684_v41 = vand.u32 4294901760, %v53_v34  ;;  %v181_v44 = vsub.f32 %v1640_v20, %v2634_v33 }
  0x15   :  { %316 = vmatpush.msra.mxu3 %v1617_v9  ;;  %v170_v43 = vand.u32 4294901760, %v169_v32  ;;  %v2631_v45 = vand.u32 4294901760, %v1657_v29  ;;  %v1692_v46 = vsub.f32 %v57_v18, %v1654_v28  ;;  %v187_v47 = vsub.f32 %v1643_v21, %v2632_v36 }
  0x16   :  { %122 = vmatpush.msra.mxu0 %v1619_v10  ;;  %159 = vmatpush.msra.mxu1 %v158_v37  ;;  %v176_v49 = vand.u32 4294901760, %v175_v39  ;;  %v1700_v50 = vand.u32 4294901760, %v51_v42  ;;  %v2630_v51 = vand.u32 4294901760, %v1681_v40  ;;  %v1704_v52 = vsub.f32 %v55_v26, %v1672_v35 }
  0x17   :  { %266 = vmatpush.msra.mxu2 %v1637_v19  ;;  %318 = vmatpush.msra.mxu3 %v1619_v10  ;;  %v1709_v53 = vsub.f32 %v53_v34, %v1684_v41  ;;  %v182_v56 = vand.u32 4294901760, %v181_v44  ;;  %v193_v57 = vsub.f32 %v1657_v29, %v2631_v45  ;;  %v1715_v58 = vand.u32 4294901760, %v49_v48  ;;  %v101_v34 = vld [vmem:[#allocation5 + $0x1d0] sm:$0xff]  ;;  %v91_v45 = vld [vmem:[#allocation5 + $0x180] sm:$0xff] }
  0x18   :  { %124 = vmatpush.msra.mxu0 %v1621_v11  ;;  %165 = vmatpush.msra.mxu1 %v164_v38  ;;  %v2629_v59 = vand.u32 4294901760, %v1692_v46  ;;  %v188_v61 = vand.u32 4294901760, %v187_v47  ;;  %v199_v63 = vsub.f32 %v1681_v40, %v2630_v51  ;;  %v1724_v0 = vand.u32 4294901760, %v47_v54  ;;  %v99_v47 = vld [vmem:[#allocation5 + $0x1c0] sm:$0xff] }
  0x19   :  { %269 = vmatpush.msra.mxu2 %v1640_v20  ;;  %320 = vmatpush.msra.mxu3 %v1621_v11  ;;  %v2627_v1 = vand.u32 4294901760, %v1704_v52  ;;  %v1728_v2 = vsub.f32 %v51_v42, %v1700_v50  ;;  %v2626_v8 = vand.u32 4294901760, %v1709_v53  ;;  %v1733_v12 = vand.u32 4294901760, %v105_v60 }
  0x1a   :  { %126 = vmatpush.msra.mxu0 %v1634_v17  ;;  %171 = vmatpush.msra.mxu1 %v170_v43  ;;  %v194_v13 = vand.u32 4294901760, %v193_v57  ;;  %v205_v18 = vsub.f32 %v1692_v46, %v2629_v59  ;;  %v1739_v26 = vand.u32 4294901760, %v45_v62  ;;  %v1742_v30 = vsub.f32 %v49_v48, %v1715_v58 }
  0x1b   :  { %272 = vmatpush.msra.mxu2 %v1643_v21  ;;  %322 = vmatpush.msra.mxu3 %v1634_v17  ;;  %v1746_v31 = vand.u32 4294901760, %v43_v6  ;;  %v1748_v32 = vand.u32 4294901760, %v103_v7  ;;  %v200_v37 = vand.u32 4294901760, %v199_v63  ;;  %v211_v38 = vsub.f32 %v1704_v52, %v2627_v1 }
  0x1c   :  { %128 = vmatpush.msra.mxu0 %v1650_v25  ;;  %177 = vmatpush.msra.mxu1 %v176_v49  ;;  %v2625_v39 = vand.u32 4294901760, %v1728_v2  ;;  %v1756_v42 = vsub.f32 %v47_v54, %v1724_v0  ;;  %v217_v43 = vsub.f32 %v1709_v53, %v2626_v8  ;;  %v1764_v44 = vsub.f32 %v105_v60, %v1733_v12  ;;  %v97_v60 = vld [vmem:[#allocation5 + $0x1b0] sm:$0xff] }
  0x1d   :  { %275 = vmatpush.msra.mxu2 %v1657_v29  ;;  %324 = vmatpush.msra.mxu3 %v1650_v25  ;;  %2673 = vst [vmem:[#allocation11_spill] sm:$0xff] %v1746_v31  ;;  %v206_v48 = vand.u32 4294901760, %v205_v18  ;;  %v2628_v49 = vand.u32 4294901760, %v1742_v30  ;;  %v1769_v54 = vsub.f32 %v45_v62, %v1739_v26  ;;  %v1771_v55 = vand.u32 4294901760, %v101_v34  ;;  %v95_v18 = vld [vmem:[#allocation5 + $0x1a0] sm:$0xff] }
  0x1e   :  { %130 = vmatpush.msra.mxu0 %v1654_v28  ;;  %183 = vmatpush.msra.mxu1 %v182_v56  ;;  %v1776_v56 = vsub.f32 %v43_v6, %v1746_v31  ;;  %v1779_v57 = vsub.f32 %v103_v7, %v1748_v32  ;;  %v223_v62 = vsub.f32 %v1728_v2, %v2625_v39  ;;  %v2633_v63 = vand.u32 4294901760, %v1756_v42 }
  0x1f   :  { %278 = vmatpush.msra.mxu2 %v1681_v40  ;;  %326 = vmatpush.msra.mxu3 %v1654_v28  ;;  %v218_v6 = vand.u32 4294901760, %v217_v43  ;;  %v2635_v7 = vand.u32 4294901760, %v1764_v44  ;;  %v1797_v39 = vsub.f32 %v101_v34, %v1771_v55  ;;  %v1799_v8 = vand.u32 4294901760, %v97_v60  ;;  %v93_v43 = vld [vmem:[#allocation5 + $0x190] sm:$0xff] }
  0x20   :  { %132 = vmatpush.msra.mxu0 %v1672_v35  ;;  %189 = vmatpush.msra.mxu1 %v188_v61  ;;  %v212_v61 = vand.u32 4294901760, %v211_v38  ;;  %v2637_v38 = vand.u32 4294901760, %v1769_v54  ;;  %v2641_v1 = vand.u32 4294901760, %v1776_v56  ;;  %v235_v34 = vsub.f32 %v1756_v42, %v2633_v63 }
  0x21   :  { %281 = vmatpush.msra.mxu2 %v1692_v46  ;;  %328 = vmatpush.msra.mxu3 %v1672_v35  ;;  %v1812_v51 = vand.u32 4294901760, %v95_v18  ;;  %v498_v36 = vsub.f32 %v1764_v44, %v2635_v7  ;;  %v2642_v63 = vand.u32 4294901760, %v1797_v39  ;;  %v1827_v33 = vsub.f32 %v97_v60, %v1799_v8 }
  0x22   :  { %134 = vmatpush.msra.mxu0 %v1684_v41  ;;  %195 = vmatpush.msra.mxu1 %v194_v13  ;;  %v1786_v13 = vand.u32 4294901760, %v99_v47  ;;  %v1834_v27 = vand.u32 4294901760, %v91_v45  ;;  %v247_v60 = vsub.f32 %v1776_v56, %v2641_v1  ;;  %v2674_v14 = vand.u32 4294901760, %v1628_v15 }
  0x23   :  { %284 = vmatpush.msra.mxu2 %v1704_v52  ;;  %330 = vmatpush.msra.mxu3 %v1684_v41  ;;  %v1842_v24 = vsub.f32 %v95_v18, %v1812_v51  ;;  %v510_v1 = vsub.f32 %v1797_v39, %v2642_v63  ;;  %v2676_v15 = vand.u32 4294901760, %v1632_v16  ;;  %v2678_v16 = vand.u32 4294901760, %v1637_v19 }
  0x24   :  { %136 = vmatpush.msra.mxu0 %v1700_v50  ;;  %201 = vmatpush.msra.mxu1 %v200_v37  ;;  %v229_v37 = vsub.f32 %v1742_v30, %v2628_v49  ;;  %v224_v49 = vand.u32 4294901760, %v223_v62  ;;  %v1810_v59 = vsub.f32 %v99_v47, %v1786_v13  ;;  %v241_v47 = vsub.f32 %v1769_v54, %v2637_v38 }
  0x25   :  { %287 = vmatpush.msra.mxu2 %v1709_v53  ;;  %332 = vmatpush.msra.mxu3 %v1700_v50  ;;  %v2680_v19 = vand.u32 4294901760, %v1640_v20  ;;  %v2682_v20 = vand.u32 4294901760, %v1643_v21  ;;  %v2685_v21 = vand.u32 4294901760, %v1657_v29  ;;  %v2687_v29 = vand.u32 4294901760, %v1681_v40 }
  0x26   :  { %138 = vmatpush.msra.mxu0 %v1715_v58  ;;  %207 = vmatpush.msra.mxu1 %v206_v48  ;;  %v2639_v48 = vand.u32 4294901760, %v1779_v57  ;;  %v230_v62 = vand.u32 4294901760, %v229_v37  ;;  %v236_v37 = vand.u32 4294901760, %v235_v34  ;;  %v242_v34 = vand.u32 4294901760, %v241_v47 }
  0x27   :  { %290 = vmatpush.msra.mxu2 %v1728_v2  ;;  %334 = vmatpush.msra.mxu3 %v1715_v58  ;;  %v2675_v47 = vand.u32 4294901760, %v1810_v59  ;;  %v2689_v40 = vand.u32 4294901760, %v1692_v46  ;;  %vm1480_vm0 = vcmask 1041408  }
  0x28   :  { %140 = vmatpush.msra.mxu0 %v1724_v0  ;;  %213 = vmatpush.msra.mxu1 %v212_v61  ;;  %v1819_v61 = vand.u32 4294901760, %v93_v43  ;;  %v504_v7 = vsub.f32 %v1779_v57, %v2639_v48  ;;  %v499_v48 = vand.u32 4294901760, %v498_v36  ;;  %v1861_v36 = vsub.f32 %v91_v45, %v1834_v27 }
  0x29   :  { %293 = vmatpush.msra.mxu2 %v1742_v30  ;;  %336 = vmatpush.msra.mxu3 %v1724_v0  ;;  %v516_v63 = vsub.f32 %v1810_v59, %v2675_v47 }
  0x2a   :  { %142 = vmatpush.msra.mxu0 %v1739_v26  ;;  %219 = vmatpush.msra.mxu1 %v218_v6  ;;  %v89_v6 = vld [vmem:[#allocation5 + $0x170] sm:$0xff]  ;;  %v1848_v23 = vsub.f32 %v93_v43, %v1819_v61 }
  0x2b   :  { %296 = vmatpush.msra.mxu2 %v1756_v42  ;;  %338 = vmatpush.msra.mxu3 %v1739_v26  ;;  %v1855_v38 = vand.u32 4294901760, %v89_v6  ;;  %v85_v43 = vld [vmem:[#allocation5 + $0x150] sm:$0xff] }
  0x2c   :  { %144 = vmatpush.msra.mxu0 %v1746_v31  ;;  %225 = vmatpush.msra.mxu1 %v224_v49  ;;  %v87_v49 = vld [vmem:[#allocation5 + $0x160] sm:$0xff]  ;;  %v1880_v18 = vand.u32 4294901760, %v85_v43 }
  0x2d   :  { %299 = vmatpush.msra.mxu2 %v1769_v54  ;;  %340 = vmatpush.msra.mxu3 %v1746_v31  ;;  %v1868_v31 = vand.u32 4294901760, %v87_v49  ;;  %v1878_v47 = vsub.f32 %v89_v6, %v1855_v38 }
  0x2e   :  { %351 = vmatpush.msrb.mxu0 %v156_v22  ;;  %231 = vmatpush.msra.mxu1 %v230_v62  ;;  %v505_v22 = vand.u32 4294901760, %v504_v7  ;;  %v248_v62 = vand.u32 4294901760, %v247_v60  ;;  %v83_v7 = vld [vmem:[#allocation5 + $0x140] sm:$0xff]  ;;  %v2677_v60 = vand.u32 4294901760, %v1827_v33 }
  0x2f   :  { %302 = vmatpush.msra.mxu2 %v1776_v56  ;;  %500 = vmatpush.msrb.mxu3 %v499_v48  ;;  %v1890_v6 = vsub.f32 %v87_v49, %v1868_v31  ;;  %v1892_v45 = vand.u32 4294901760, %v83_v7  ;;  %v1903_v49 = vsub.f32 %v85_v43, %v1880_v18 }
  0x30   :  { %355 = vmatpush.msrb.mxu0 %v2674_v14  ;;  %237 = vmatpush.msra.mxu1 %v236_v37  ;;  %v511_v37 = vand.u32 4294901760, %v510_v1  ;;  %v522_v14 = vsub.f32 %v1827_v33, %v2677_v60  ;;  %v517_v1 = vand.u32 4294901760, %v516_v63 }
  0x31   :  { %455 = vmatpush.msrb.mxu2 %v1733_v12  ;;  %506 = vmatpush.msrb.mxu3 %v505_v22  ;;  %v2681_v22 = vand.u32 4294901760, %v1848_v23  ;;  %v1916_v43 = vsub.f32 %v83_v7, %v1892_v45 }
  0x32   :  { %359 = vmatpush.msrb.mxu0 %v2676_v15  ;;  %243 = vmatpush.msra.mxu1 %v242_v34  ;;  %v81_v15 = vld [vmem:[#allocation5 + $0x130] sm:$0xff]  ;;  %v2679_v34 = vand.u32 4294901760, %v1842_v24  ;;  %v523_v63 = vand.u32 4294901760, %v522_v14 }
  0x33   :  { %457 = vmatpush.msrb.mxu2 %v1748_v32  ;;  %512 = vmatpush.msrb.mxu3 %v511_v37  ;;  %v1905_v48 = vand.u32 4294901760, %v81_v15 }
  0x34   :  { %363 = vmatpush.msrb.mxu0 %v2678_v16  ;;  %249 = vmatpush.msra.mxu1 %v248_v62  ;;  %v528_v60 = vsub.f32 %v1842_v24, %v2679_v34  ;;  %v534_v62 = vsub.f32 %v1848_v23, %v2681_v22  ;;  %v109_v16 = vld.sshfl [vmem:[#allocation1] sm:$0xff pattern:$0x73625140]  ;;  %v79_v22 = vld [vmem:[#allocation5 + $0x120] sm:$0xff] }
  0x35   :  { %459 = vmatpush.msrb.mxu2 %v1771_v55  ;;  %518 = vmatpush.msrb.mxu3 %v517_v1  ;;  %v1918_v34 = vand.u32 4294901760, %v109_v16  ;;  %v2686_v1 = vand.u32 4294901760, %v1878_v47  ;;  %v1928_v7 = vand.u32 4294901760, %v79_v22  ;;  %v1931_v14 = vsub.f32 %v81_v15, %v1905_v48 }
  0x36   :  { %367 = vmatpush.msrb.mxu0 %v2680_v19  ;;  %418 = vmatpush.msrb.mxu1 %v1611_v3  ;;  %v2683_v3 = vand.u32 4294901760, %v1861_v36  ;;  %v529_v37 = vand.u32 4294901760, %v528_v60 }
  0x37   :  { %461 = vmatpush.msrb.mxu2 %v1786_v13  ;;  %2684 = vst [vmem:[#allocation12_spill] sm:$0xff] %v1918_v34  ;;  %524 = vmatpush.msrb.mxu3 %v523_v63  ;;  %v546_v60 = vsub.f32 %v1878_v47, %v2686_v1  ;;  %v1942_v1 = vsub.f32 %v109_v16, %v1918_v34 }
  0x38   :  { %371 = vmatpush.msrb.mxu0 %v2682_v20  ;;  %420 = vmatpush.msrb.mxu1 %v1613_v4  ;;  %v540_v19 = vsub.f32 %v1861_v36, %v2683_v3  ;;  %v535_v4 = vand.u32 4294901760, %v534_v62  ;;  %v77_v20 = vld [vmem:[#allocation5 + $0x110] sm:$0xff]  ;;  %v2688_v62 = vand.u32 4294901760, %v1890_v6  ;;  %v75_v3 = vld [vmem:[#allocation5 + $0x100] sm:$0xff]  ;;  %v1955_v16 = vsub.f32 %v79_v22, %v1928_v7 }
  0x39   :  { %463 = vmatpush.msrb.mxu2 %v1799_v8  ;;  %530 = vmatpush.msrb.mxu3 %v529_v37  ;;  %v1944_v15 = vand.u32 4294901760, %v77_v20  ;;  %v1960_v46 = vand.u32 4294901760, %v75_v3 }
  0x3a   :  { %375 = vmatpush.msrb.mxu0 %v2685_v21  ;;  %422 = vmatpush.msrb.mxu1 %v1615_v5  ;;  %v541_v5 = vand.u32 4294901760, %v540_v19  ;;  %v552_v63 = vsub.f32 %v1890_v6, %v2688_v62  ;;  %v563_v21 = vand.u32 4294901760, %v1916_v43  ;;  %v2690_v19 = vand.u32 4294901760, %v1903_v49 }
  0x3b   :  { %465 = vmatpush.msrb.mxu2 %v1812_v51  ;;  %536 = vmatpush.msrb.mxu3 %v535_v4  ;;  %v2691_v62 = vand.u32 4294901760, %v1704_v52  ;;  %v1970_v22 = vsub.f32 %v77_v20, %v1944_v15  ;;  %v2693_v52 = vand.u32 4294901760, %v1709_v53  ;;  %v1984_v53 = vsub.f32 %v75_v3, %v1960_v46 }
  0x3c   :  { %379 = vmatpush.msrb.mxu0 %v2687_v29  ;;  %424 = vmatpush.msrb.mxu1 %v1617_v9  ;;  %v547_v9 = vand.u32 4294901760, %v546_v60  ;;  %v558_v37 = vsub.f32 %v1903_v49, %v2690_v19  ;;  %v569_v29 = vand.u32 4294901760, %v1931_v14  ;;  %v564_v4 = vsub.f32 %v1916_v43, %v563_v21 }
  0x3d   :  { %467 = vmatpush.msrb.mxu2 %v1819_v61  ;;  %542 = vmatpush.msrb.mxu3 %v541_v5  ;;  %v1967_v60 = vand.u32 4294901760, %v1942_v1  ;;  %v2694_v19 = vand.u32 4294901760, %v1728_v2  ;;  %v2697_v3 = vand.u32 4294901760, %v1756_v42  ;;  %v2700_v42 = vand.u32 4294901760, %v1776_v56 }
  0x3e   :  { %383 = vmatpush.msrb.mxu0 %v2689_v40  ;;  %426 = vmatpush.msrb.mxu1 %v1619_v10  ;;  %v553_v10 = vand.u32 4294901760, %v552_v63  ;;  %v559_v5 = vand.u32 4294901760, %v558_v37  ;;  %v570_v63 = vsub.f32 %v1931_v14, %v569_v29  ;;  %v575_v40 = vand.u32 4294901760, %v1955_v16 }
  0x3f   :  { %469 = vmatpush.msrb.mxu2 %v1834_v27  ;;  %2692 = vst [vmem:[#allocation13_spill] sm:$0xff] %v1967_v60  ;;  %548 = vmatpush.msrb.mxu3 %v547_v9  ;;  %v148_v20 = vsub.f32 %v1942_v1, %v1967_v60  ;;  %v581_v9 = vand.u32 4294901760, %v1970_v22 }
  0x40   :  { %387 = vmatpush.msrb.mxu0 %v2691_v62  ;;  %428 = vmatpush.msrb.mxu1 %v1621_v11  ;;  %v110_v11 = vld.sshfl [vmem:[#allocation1 + $0x8] sm:$0xff pattern:$0x73625140]  ;;  %v2696_v62 = vand.u32 4294901760, %v1742_v30  ;;  %v576_v2 = vsub.f32 %v1955_v16, %v575_v40 }
  0x41   :  { %471 = vmatpush.msrb.mxu2 %v1855_v38  ;;  %554 = vmatpush.msrb.mxu3 %v553_v10  ;;  %v1990_v37 = vand.u32 4294901760, %v110_v11  ;;  %v587_v10 = vand.u32 4294901760, %v1984_v53  ;;  %v2004_v30 = vand.u32 4294901760, %v148_v20 }
  0x42   :  { %391 = vmatpush.msrb.mxu0 %v2693_v52  ;;  %430 = vmatpush.msrb.mxu1 %v1634_v17  ;;  %v565_v17 = vand.u32 4294901760, %v564_v4  ;;  %v2699_v52 = vand.u32 4294901760, %v1769_v54 }
  0x43   :  { %473 = vmatpush.msrb.mxu2 %v1868_v31  ;;  %2695 = vst [vmem:[#allocation14_spill] sm:$0xff] %v1990_v37  ;;  %560 = vmatpush.msrb.mxu3 %v559_v5  ;;  %v2010_v4 = vsub.f32 %v110_v11, %v1990_v37  ;;  %v588_v5 = vsub.f32 %v1984_v53, %v587_v10 }
  0x44   :  { %395 = vmatpush.msrb.mxu0 %v2694_v19  ;;  %432 = vmatpush.msrb.mxu1 %v1650_v25  ;;  %v571_v25 = vand.u32 4294901760, %v570_v63  ;;  %v2705_v63 = vld [vmem:[#allocation11_spill] sm:$0xff] }
  0x45   :  { %475 = vmatpush.msrb.mxu2 %v1880_v18  ;;  %566 = vmatpush.msrb.mxu3 %v565_v17  ;;  %2698 = vst [vmem:[#allocation15_spill] sm:$0xff] %v2010_v4  ;;  %v58_v17 = vld [vmem:[#allocation5 + $0x78] sm:$0xff] }
  0x46   :  { %399 = vmatpush.msrb.mxu0 %v2696_v62  ;;  %434 = vmatpush.msrb.mxu1 %v1654_v28  ;;  %v582_v28 = vsub.f32 %v1970_v22, %v581_v9  ;;  %v56_v62 = vld [vmem:[#allocation5 + $0x68] sm:$0xff] }
  0x47   :  { %477 = vmatpush.msrb.mxu2 %v1892_v45  ;;  %572 = vmatpush.msrb.mxu3 %v571_v25  ;;  %v2172_v25 = vand.u32 4294901760, %v58_v17 }
  0x48   :  { %403 = vmatpush.msrb.mxu0 %v2697_v3  ;;  %436 = vmatpush.msrb.mxu1 %v1672_v35  ;;  %v577_v35 = vand.u32 4294901760, %v576_v2  ;;  %v583_v54 = vand.u32 4294901760, %v582_v28 }
  0x49   :  { %479 = vmatpush.msrb.mxu2 %v1905_v48  ;;  %150 = vmatmul.f32.vlgmr.msra.gmra.mxu0 %v2004_v30 }
  0x4a   :  { %407 = vmatpush.msrb.mxu0 %v2699_v52  ;;  %438 = vmatpush.msrb.mxu1 %v1684_v41  ;;  %v2025_v41 = vand.u32 4294901760, %v2010_v4  ;;  %v54_v52 = vld [vmem:[#allocation5 + $0x58] sm:$0xff] }
  0x4b   :  { %481 = vmatpush.msrb.mxu2 %v1928_v7  ;;  %578 = vmatpush.msrb.mxu3 %v577_v35 }
  0x4c   :  { %411 = vmatpush.msrb.mxu0 %v2700_v42  ;;  %440 = vmatpush.msrb.mxu1 %v1700_v50  ;;  %2701 = vst [vmem:[#allocation16_spill] sm:$0xff] %v2025_v41  ;;  %v589_v50 = vand.u32 4294901760, %v588_v5  ;;  %v489_v56 = vsub.f32 %v2010_v4, %v2025_v41 }
  0x4d   :  { %483 = vmatpush.msrb.mxu2 %v1944_v15  ;;  %584 = vmatpush.msrb.mxu3 %v583_v54 }
  0x4e   :  { %598 = vmatpush.msra.mxu0 %v1764_v44  ;;  %442 = vmatpush.msrb.mxu1 %v1715_v58  ;;  %v2702_v58 = vand.u32 4294901760, %v1764_v44  ;;  %v2044_v11 = vand.u32 4294901760, %v489_v56  ;;  %v2707_v44 = vand.u32 4294901760, %v1810_v59 }
  0x4f   :  { %305 = vmatmul.f32.vlgmr.msra.gmra.mxu2 %v1942_v1  ;;  %344 = vmatmul.f32.vlgmr.msra.gmra.mxu3 %v1967_v60 }
  0x50   :  { %601 = vmatpush.msra.mxu0 %v1779_v57  ;;  %444 = vmatpush.msrb.mxu1 %v1724_v0  ;;  %v2703_v0 = vand.u32 4294901760, %v1779_v57  ;;  %2704 = vst [vmem:[#allocation17_spill] sm:$0xff] %v2044_v11  ;;  %v2714_v57 = vand.u32 4294901760, %v1903_v49 }
  0x51   :  { %485 = vmatpush.msrb.mxu2 %v1960_v46  ;;  %590 = vmatpush.msrb.mxu3 %v589_v50  ;;  %v2199_v50 = vsub.f32 %v58_v17, %v2172_v25  ;;  %v106_v17 = vld [vmem:[#allocation5 + $0x1f8] sm:$0xff] }
  0x52   :  { %604 = vmatpush.msra.mxu0 %v1797_v39  ;;  %446 = vmatpush.msrb.mxu1 %v1739_v26  ;;  %v2706_v26 = vand.u32 4294901760, %v1797_v39 }
  0x53   :  { %692 = vmatpush.msra.mxu2 %v2702_v58  ;;  %251 = vmatmul.f32.vlgmr.msra.gmra.mxu1 %v1918_v34 }
  0x54   :  { %607 = vmatpush.msra.mxu0 %v1810_v59  ;;  %759 = vmatpush.msra.mxu3 %v1733_v12  ;;  %v2709_v59 = vand.u32 4294901760, %v1842_v24 }
  0x55   :  { %696 = vmatpush.msra.mxu2 %v2703_v0  ;;  %448 = vmatpush.msrb.mxu1 %v2705_v63  ;;  %v2205_v0 = vand.u32 4294901760, %v54_v52 }
  0x56   :  { %610 = vmatpush.msra.mxu0 %v1827_v33  ;;  %761 = vmatpush.msra.mxu3 %v1748_v32 }
  0x57   :  { %651 = vmatpush.msra.mxu1 %v1733_v12  ;;  %700 = vmatpush.msra.mxu2 %v2706_v26  ;;  %v2708_v12 = vand.u32 4294901760, %v1827_v33  ;;  %v2710_v33 = vand.u32 4294901760, %v1848_v23 }
  0x58   :  { %491 = vmatmul.f32.vlgmr.msrb.gmra.mxu2 %v2044_v11  ;;  %613 = vmatpush.msra.mxu0 %v1842_v24  ;;  %v74_v24 = vld [vmem:[#allocation5 + $0xf8] sm:$0xff] }
  0x59   :  { %653 = vmatpush.msra.mxu1 %v1748_v32  ;;  %704 = vmatpush.msra.mxu2 %v2707_v44  ;;  %v2711_v32 = vand.u32 4294901760, %v1861_v36  ;;  %v2092_v39 = vand.u32 4294901760, %v74_v24  ;;  %v50_v44 = vld [vmem:[#allocation5 + $0x38] sm:$0xff] }
  0x5a   :  { %763 = vmatpush.msra.mxu3 %v1771_v55  ;;  %413 = vmatmul.f32.vlgmr.msrb.gmra.mxu0 %v1918_v34 }
  0x5b   :  { %592 = vmatmul.f32.vlgmr.msrb.gmra.mxu3 %v1990_v37  ;;  %616 = vmatpush.msra.mxu0 %v1848_v23  ;;  %v72_v23 = vld [vmem:[#allocation5 + $0xe8] sm:$0xff] }
  0x5c   :  { %655 = vmatpush.msra.mxu1 %v1771_v55  ;;  %708 = vmatpush.msra.mxu2 %v2708_v12  ;;  %v70_v55 = vld [vmem:[#allocation5 + $0xd8] sm:$0xff] }
  0x5d   :  { %765 = vmatpush.msra.mxu3 %v1786_v13  ;;  %450 = vmatmul.f32.vlgmr.msrb.gmra.mxu1 %v1918_v34 }
  0x5e   :  { %619 = vmatpush.msra.mxu0 %v1861_v36  ;;  %657 = vmatpush.msra.mxu1 %v1786_v13  ;;  %v2099_v13 = vand.u32 4294901760, %v72_v23  ;;  %v66_v36 = vld [vmem:[#allocation5 + $0xb8] sm:$0xff] }
  0x5f   :  { %712 = vmatpush.msra.mxu2 %v2709_v59  ;;  %767 = vmatpush.msra.mxu3 %v1799_v8 }
  0x60   :  { %622 = vmatpush.msra.mxu0 %v1878_v47  ;;  %659 = vmatpush.msra.mxu1 %v1799_v8  ;;  %v2712_v8 = vand.u32 4294901760, %v1878_v47  ;;  %v2119_v47 = vsub.f32 %v72_v23, %v2099_v13 }
  0x61   :  { %716 = vmatpush.msra.mxu2 %v2710_v33  ;;  %769 = vmatpush.msra.mxu3 %v1812_v51 }
  0x62   :  { %625 = vmatpush.msra.mxu0 %v1890_v6  ;;  %661 = vmatpush.msra.mxu1 %v1812_v51  ;;  %v2713_v51 = vand.u32 4294901760, %v1890_v6  ;;  %v64_v6 = vld [vmem:[#allocation5 + $0xa8] sm:$0xff] }
  0x63   :  { %720 = vmatpush.msra.mxu2 %v2711_v32  ;;  %771 = vmatpush.msra.mxu3 %v1819_v61 }
  0x64   :  { %628 = vmatpush.msra.mxu0 %v1903_v49  ;;  %663 = vmatpush.msra.mxu1 %v1819_v61  ;;  %v2106_v61 = vand.u32 4294901760, %v70_v55 }
  0x65   :  { %724 = vmatpush.msra.mxu2 %v2712_v8  ;;  %773 = vmatpush.msra.mxu3 %v1834_v27  ;;  %v48_v8 = vld [vmem:[#allocation5 + $0x28] sm:$0xff] }
  0x66   :  { %631 = vmatpush.msra.mxu0 %v1916_v43  ;;  %665 = vmatpush.msra.mxu1 %v1834_v27  ;;  %v68_v27 = vld [vmem:[#allocation5 + $0xc8] sm:$0xff]  ;;  %v62_v43 = vld [vmem:[#allocation5 + $0x98] sm:$0xff] }
  0x67   :  { %728 = vmatpush.msra.mxu2 %v2713_v51  ;;  %775 = vmatpush.msra.mxu3 %v1855_v38 }
  0x68   :  { %634 = vmatpush.msra.mxu0 %v1931_v14  ;;  %667 = vmatpush.msra.mxu1 %v1855_v38  ;;  %v2109_v38 = vsub.f32 %v74_v24, %v2092_v39  ;;  %v2130_v14 = vsub.f32 %v70_v55, %v2106_v61  ;;  %v2645_v24 = vand.u32 4294901760, %v2199_v50  ;;  %v2227_v55 = vand.u32 4294901760, %v50_v44 }
  0x69   :  { %732 = vmatpush.msra.mxu2 %v2714_v57  ;;  %777 = vmatpush.msra.mxu3 %v1868_v31  ;;  %v2230_v57 = vsub.f32 %v54_v52, %v2205_v0 }
  0x6a   :  { %637 = vmatpush.msra.mxu0 %v1955_v16  ;;  %669 = vmatpush.msra.mxu1 %v1868_v31  ;;  %v2116_v31 = vand.u32 4294901760, %v68_v27  ;;  %v2657_v49 = vand.u32 4294901760, %v2109_v38  ;;  %v60_v16 = vld [vmem:[#allocation5 + $0x88] sm:$0xff] }
  0x6b   :  { %736 = vmatpush.msra.mxu2 %v563_v21  ;;  %779 = vmatpush.msra.mxu3 %v1880_v18  ;;  %v2655_v21 = vand.u32 4294901760, %v2119_v47  ;;  %v2646_v52 = vand.u32 4294901760, %v2230_v57 }
  0x6c   :  { %640 = vmatpush.msra.mxu0 %v1970_v22  ;;  %671 = vmatpush.msra.mxu1 %v1880_v18  ;;  %v2126_v18 = vand.u32 4294901760, %v66_v36  ;;  %v2151_v22 = vand.u32 4294901760, %v62_v43 }
  0x6d   :  { %740 = vmatpush.msra.mxu2 %v569_v29  ;;  %781 = vmatpush.msra.mxu3 %v1892_v45  ;;  %v2141_v29 = vsub.f32 %v68_v27, %v2116_v31 }
  0x6e   :  { %643 = vmatpush.msra.mxu0 %v1984_v53  ;;  %673 = vmatpush.msra.mxu1 %v1892_v45  ;;  %v2137_v45 = vand.u32 4294901760, %v64_v6  ;;  %v2155_v19 = vsub.f32 %v66_v36, %v2126_v18  ;;  %v2164_v53 = vand.u32 4294901760, %v60_v16  ;;  %v2181_v28 = vsub.f32 %v62_v43, %v2151_v22  ;;  %v46_v36 = vld [vmem:[#allocation5 + $0x18] sm:$0xff] }
  0x6f   :  { %744 = vmatpush.msra.mxu2 %v575_v40  ;;  %783 = vmatpush.msra.mxu3 %v1905_v48  ;;  %v2654_v40 = vand.u32 4294901760, %v2130_v14  ;;  %v2652_v20 = vand.u32 4294901760, %v2141_v29 }
  0x70   :  { %646 = vmatmul.f32.vlgmr.msra.gmra.mxu0 %v2010_v4  ;;  %675 = vmatpush.msra.mxu1 %v1905_v48  ;;  %v839_v48 = vsub.f32 %v2109_v38, %v2657_v49  ;;  %v2194_v54 = vsub.f32 %v60_v16, %v2164_v53  ;;  %v2648_v63 = vand.u32 4294901760, %v2181_v28  ;;  %v2239_v16 = vand.u32 4294901760, %v48_v8 }
  0x71   :  { %796 = vmatpush.msrb.mxu0 %v2092_v39  ;;  %748 = vmatpush.msra.mxu2 %v581_v9  ;;  %v2168_v9 = vsub.f32 %v64_v6, %v2137_v45  ;;  %v851_v3 = vsub.f32 %v2130_v14, %v2654_v40  ;;  %v857_v42 = vsub.f32 %v2141_v29, %v2652_v20 }
  0x72   :  { %785 = vmatpush.msra.mxu3 %v1928_v7  ;;  %677 = vmatpush.msra.mxu1 %v1928_v7  ;;  %v845_v7 = vsub.f32 %v2119_v47, %v2655_v21  ;;  %v840_v2 = vand.u32 4294901760, %v839_v48  ;;  %v2647_v32 = vand.u32 4294901760, %v2194_v54  ;;  %v875_v51 = vsub.f32 %v2181_v28, %v2648_v63 }
  0x73   :  { %798 = vmatpush.msrb.mxu0 %v2099_v13  ;;  %752 = vmatpush.msra.mxu2 %v587_v10  ;;  %v2651_v10 = vand.u32 4294901760, %v2155_v19  ;;  %v2649_v5 = vand.u32 4294901760, %v2168_v9  ;;  %v852_v56 = vand.u32 4294901760, %v851_v3  ;;  %v858_v12 = vand.u32 4294901760, %v857_v42 }
  0x74   :  { %787 = vmatpush.msra.mxu3 %v1944_v15  ;;  %754 = vmatmul.f32.vlgmr.msra.gmra.mxu2 %v1990_v37  ;;  %v846_v35 = vand.u32 4294901760, %v845_v7  ;;  %v881_v43 = vsub.f32 %v2194_v54, %v2647_v32  ;;  %v887_v7 = vsub.f32 %v2199_v50, %v2645_v24  ;;  %v2250_v3 = vand.u32 4294901760, %v46_v36  ;;  %v100_v24 = vld [vmem:[#allocation5 + $0x1c8] sm:$0xff] }
  0x75   :  { %800 = vmatpush.msrb.mxu0 %v2106_v61  ;;  %939 = vmatpush.msrb.mxu2 %v2109_v38  ;;  %v863_v58 = vsub.f32 %v2155_v19, %v2651_v10  ;;  %v869_v59 = vsub.f32 %v2168_v9, %v2649_v5  ;;  %v98_v5 = vld [vmem:[#allocation5 + $0x1b8] sm:$0xff] }
  0x76   :  { %679 = vmatpush.msra.mxu1 %v1944_v15  ;;  %789 = vmatpush.msra.mxu3 %v1960_v46  ;;  %v2185_v15 = vand.u32 4294901760, %v56_v62  ;;  %v2312_v20 = vand.u32 4294901760, %v98_v5 }
  0x77   :  { %791 = vmatmul.f32.vlgmr.msra.gmra.mxu3 %v1990_v37  ;;  %802 = vmatpush.msrb.mxu0 %v2116_v31  ;;  %v864_v23 = vand.u32 4294901760, %v863_v58  ;;  %v870_v6 = vand.u32 4294901760, %v869_v59  ;;  %v882_v58 = vand.u32 4294901760, %v881_v43  ;;  %v2268_v59 = vsub.f32 %v48_v8, %v2239_v16 }
  0x78   :  { %942 = vmatpush.msrb.mxu2 %v2119_v47  ;;  %992 = vmatpush.msrb.mxu3 %v2092_v39  ;;  %v2211_v26 = vsub.f32 %v56_v62, %v2185_v15  ;;  %v44_v62 = vld [vmem:[#allocation5 + $0x8] sm:$0xff]  ;;  %v2717_v37 = vand.u32 4294901760, %v2109_v38 }
  0x79   :  { %681 = vmatpush.msra.mxu1 %v1960_v46  ;;  %804 = vmatpush.msrb.mxu0 %v2126_v18  ;;  %v52_v46 = vld [vmem:[#allocation5 + $0x48] sm:$0xff] }
  0x7a   :  { %685 = vmatmul.f32.vlgmr.msra.gmra.mxu1 %v2025_v41  ;;  %945 = vmatpush.msrb.mxu2 %v2130_v14  ;;  %v2217_v33 = vand.u32 4294901760, %v52_v46  ;;  %v2644_v27 = vand.u32 4294901760, %v2211_v26 }
  0x7b   :  { %841 = vmatpush.msrb.mxu1 %v840_v2  ;;  %994 = vmatpush.msrb.mxu3 %v2099_v13  ;;  %v876_v2 = vand.u32 4294901760, %v875_v51  ;;  %v102_v51 = vld [vmem:[#allocation5 + $0x1d8] sm:$0xff] }
  0x7c   :  { %806 = vmatpush.msrb.mxu0 %v2137_v45  ;;  %948 = vmatpush.msrb.mxu2 %v2141_v29  ;;  %v2242_v48 = vsub.f32 %v52_v46, %v2217_v33  ;;  %v893_v42 = vsub.f32 %v2211_v26, %v2644_v27  ;;  %v2261_v46 = vand.u32 4294901760, %v106_v17  ;;  %v2278_v27 = vsub.f32 %v46_v36, %v2250_v3 }
  0x7d   :  { %847 = vmatpush.msrb.mxu1 %v846_v35  ;;  %996 = vmatpush.msrb.mxu3 %v2106_v61  ;;  %v2254_v35 = vsub.f32 %v50_v44, %v2227_v55  ;;  %v2656_v36 = vand.u32 4294901760, %v2268_v59  ;;  %v2295_v63 = vand.u32 4294901760, %v102_v51 }
  0x7e   :  { %808 = vmatpush.msrb.mxu0 %v2151_v22  ;;  %951 = vmatpush.msrb.mxu2 %v2155_v19  ;;  %v2650_v44 = vand.u32 4294901760, %v2242_v48 }
  0x7f   :  { %853 = vmatpush.msrb.mxu1 %v852_v56  ;;  %998 = vmatpush.msrb.mxu3 %v2116_v31  ;;  %v104_v56 = vld [vmem:[#allocation5 + $0x1e8] sm:$0xff]  ;;  %v2653_v43 = vand.u32 4294901760, %v2254_v35  ;;  %v2320_v40 = vsub.f32 %v102_v51, %v2295_v63 }
  0x80   :  { %810 = vmatpush.msrb.mxu0 %v2164_v53  ;;  %954 = vmatpush.msrb.mxu2 %v2168_v9  ;;  %v2280_v8 = vand.u32 4294901760, %v104_v56 }
  0x81   :  { %859 = vmatpush.msrb.mxu1 %v858_v12  ;;  %1000 = vmatpush.msrb.mxu3 %v2126_v18  ;;  %v2264_v12 = vand.u32 4294901760, %v44_v62 }
  0x82   :  { %812 = vmatpush.msrb.mxu0 %v2172_v25  ;;  %957 = vmatpush.msrb.mxu2 %v2181_v28  ;;  %2716 = vst [vmem:[#allocation18_spill] sm:$0xff] %v2280_v8 }
  0x83   :  { %865 = vmatpush.msrb.mxu1 %v864_v23  ;;  %1002 = vmatpush.msrb.mxu3 %v2137_v45  ;;  %2715 = vst [vmem:[#allocation11_spill] sm:$0xff] %v2264_v12  ;;  %v888_v23 = vand.u32 4294901760, %v887_v7  ;;  %v894_v7 = vand.u32 4294901760, %v893_v42  ;;  %v2293_v32 = vsub.f32 %v44_v62, %v2264_v12  ;;  %v2658_v62 = vand.u32 4294901760, %v2278_v27 }
  0x84   :  { %814 = vmatpush.msrb.mxu0 %v2185_v15  ;;  %960 = vmatpush.msrb.mxu2 %v2194_v54 }
  0x85   :  { %871 = vmatpush.msrb.mxu1 %v870_v6  ;;  %1004 = vmatpush.msrb.mxu3 %v2151_v22  ;;  %v899_v6 = vsub.f32 %v2230_v57, %v2646_v52  ;;  %v905_v52 = vsub.f32 %v2242_v48, %v2650_v44  ;;  %v2307_v44 = vsub.f32 %v104_v56, %v2280_v8  ;;  %v2664_v56 = vand.u32 4294901760, %v2293_v32 }
  0x86   :  { %816 = vmatpush.msrb.mxu0 %v2205_v0  ;;  %963 = vmatpush.msrb.mxu2 %v2199_v50 }
  0x87   :  { %877 = vmatpush.msrb.mxu1 %v876_v2  ;;  %1006 = vmatpush.msrb.mxu3 %v2164_v53  ;;  %v2285_v2 = vsub.f32 %v106_v17, %v2261_v46  ;;  %v2299_v17 = vand.u32 4294901760, %v100_v24  ;;  %v900_v42 = vand.u32 4294901760, %v899_v6  ;;  %v906_v6 = vand.u32 4294901760, %v905_v52 }
  0x88   :  { %818 = vmatpush.msrb.mxu0 %v2217_v33  ;;  %966 = vmatpush.msrb.mxu2 %v2211_v26  ;;  %v929_v49 = vsub.f32 %v2293_v32, %v2664_v56 }
  0x89   :  { %883 = vmatpush.msrb.mxu1 %v882_v58  ;;  %1008 = vmatpush.msrb.mxu3 %v2172_v25  ;;  %v911_v58 = vsub.f32 %v2254_v35, %v2653_v43  ;;  %v2663_v10 = vand.u32 4294901760, %v2285_v2  ;;  %v917_v43 = vsub.f32 %v2268_v59, %v2656_v36  ;;  %v2325_v21 = vsub.f32 %v100_v24, %v2299_v17 }
  0x8a   :  { %820 = vmatpush.msrb.mxu0 %v2227_v55  ;;  %969 = vmatpush.msrb.mxu2 %v2230_v57  ;;  %v923_v36 = vsub.f32 %v2278_v27, %v2658_v62 }
  0x8b   :  { %889 = vmatpush.msrb.mxu1 %v888_v23  ;;  %1010 = vmatpush.msrb.mxu3 %v2185_v15  ;;  %v96_v23 = vld [vmem:[#allocation5 + $0x1a8] sm:$0xff]  ;;  %v912_v52 = vand.u32 4294901760, %v911_v58  ;;  %v1180_v24 = vsub.f32 %v2285_v2, %v2663_v10  ;;  %v918_v62 = vand.u32 4294901760, %v917_v43  ;;  %v90_v10 = vld [vmem:[#allocation5 + $0x178] sm:$0xff] }
  0x8c   :  { %822 = vmatpush.msrb.mxu0 %v2239_v16  ;;  %972 = vmatpush.msrb.mxu2 %v2242_v48  ;;  %v2332_v51 = vand.u32 4294901760, %v96_v23  ;;  %v92_v58 = vld [vmem:[#allocation5 + $0x188] sm:$0xff]  ;;  %v924_v43 = vand.u32 4294901760, %v923_v36  ;;  %v930_v36 = vand.u32 4294901760, %v929_v49  ;;  %v2373_v60 = vand.u32 4294901760, %v90_v10 }
  0x8d   :  { %895 = vmatpush.msrb.mxu1 %v894_v7  ;;  %1012 = vmatpush.msrb.mxu3 %v2205_v0  ;;  %v94_v7 = vld [vmem:[#allocation5 + $0x198] sm:$0xff]  ;;  %v2360_v11 = vand.u32 4294901760, %v92_v58  ;;  %v1181_v38 = vand.u32 4294901760, %v1180_v24  ;;  %v2722_v24 = vand.u32 4294901760, %v2325_v21 }
  0x8e   :  { %824 = vmatpush.msrb.mxu0 %v2250_v3  ;;  %975 = vmatpush.msrb.mxu2 %v2254_v35  ;;  %v2347_v4 = vand.u32 4294901760, %v94_v7  ;;  %v2358_v41 = vsub.f32 %v96_v23, %v2332_v51 }
  0x8f   :  { %901 = vmatpush.msrb.mxu1 %v900_v42  ;;  %1014 = vmatpush.msrb.mxu3 %v2217_v33  ;;  %v2340_v42 = vsub.f32 %v98_v5, %v2312_v20  ;;  %v88_v5 = vld [vmem:[#allocation5 + $0x168] sm:$0xff] }
  0x90   :  { %826 = vmatpush.msrb.mxu0 %v2264_v12  ;;  %978 = vmatpush.msrb.mxu2 %v2268_v59  ;;  %v2371_v34 = vsub.f32 %v94_v7, %v2347_v4  ;;  %v2384_v7 = vsub.f32 %v92_v58, %v2360_v11  ;;  %v2396_v58 = vsub.f32 %v90_v10, %v2373_v60 }
  0x91   :  { %907 = vmatpush.msrb.mxu1 %v906_v6  ;;  %1016 = vmatpush.msrb.mxu3 %v2227_v55  ;;  %v2718_v6 = vand.u32 4294901760, %v2307_v44 }
  0x92   :  { %1033 = vmatpush.msra.mxu0 %v2717_v37  ;;  %981 = vmatpush.msrb.mxu2 %v2278_v27  ;;  %v2719_v37 = vand.u32 4294901760, %v2119_v47  ;;  %v2721_v47 = vand.u32 4294901760, %v2130_v14  ;;  %v2723_v14 = vand.u32 4294901760, %v2141_v29  ;;  %v2725_v29 = vand.u32 4294901760, %v2155_v19 }
  0x93   :  { %913 = vmatpush.msrb.mxu1 %v912_v52  ;;  %1018 = vmatpush.msrb.mxu3 %v2239_v16  ;;  %v1186_v56 = vsub.f32 %v2307_v44, %v2718_v6  ;;  %v2720_v6 = vand.u32 4294901760, %v2320_v40  ;;  %v2386_v52 = vand.u32 4294901760, %v88_v5  ;;  %v2727_v19 = vand.u32 4294901760, %v2168_v9 }
  0x94   :  { %1037 = vmatpush.msra.mxu0 %v2719_v37  ;;  %984 = vmatpush.msrb.mxu2 %v2293_v32  ;;  %v86_v37 = vld [vmem:[#allocation5 + $0x158] sm:$0xff]  ;;  %v2728_v9 = vand.u32 4294901760, %v2181_v28 }
  0x95   :  { %919 = vmatpush.msrb.mxu1 %v918_v62  ;;  %1020 = vmatpush.msrb.mxu3 %v2250_v3  ;;  %v1192_v23 = vsub.f32 %v2320_v40, %v2720_v6  ;;  %v1198_v62 = vsub.f32 %v2325_v21, %v2722_v24  ;;  %v1187_v49 = vand.u32 4294901760, %v1186_v56  ;;  %v2672_v6 = vand.u32 4294901760, %v2371_v34 }
  0x96   :  { %1041 = vmatpush.msra.mxu0 %v2721_v47  ;;  %1137 = vmatpush.msra.mxu2 %v2261_v46  ;;  %v2724_v47 = vand.u32 4294901760, %v2340_v42  ;;  %v2409_v10 = vsub.f32 %v88_v5, %v2386_v52 }
  0x97   :  { %925 = vmatpush.msrb.mxu1 %v924_v43  ;;  %1022 = vmatpush.msrb.mxu3 %v2264_v12  ;;  %v84_v43 = vld [vmem:[#allocation5 + $0x148] sm:$0xff]  ;;  %v1193_v56 = vand.u32 4294901760, %v1192_v23  ;;  %v2398_v12 = vand.u32 4294901760, %v86_v37  ;;  %v1221_v23 = vand.u32 4294901760, %v2384_v7 }
  0x98   :  { %1045 = vmatpush.msra.mxu0 %v2723_v14  ;;  %1139 = vmatpush.msra.mxu2 %v2280_v8  ;;  %v1204_v24 = vsub.f32 %v2340_v42, %v2724_v47  ;;  %v1199_v14 = vand.u32 4294901760, %v1198_v62  ;;  %v82_v8 = vld [vmem:[#allocation5 + $0x138] sm:$0xff]  ;;  %v2411_v47 = vand.u32 4294901760, %v84_v43  ;;  %v1216_v62 = vsub.f32 %v2371_v34, %v2672_v6 }
  0x99   :  { %1182 = vmatpush.msra.mxu3 %v1181_v38  ;;  %931 = vmatpush.msrb.mxu1 %v930_v36  ;;  %v2726_v38 = vand.u32 4294901760, %v2358_v41  ;;  %v2422_v5 = vsub.f32 %v86_v37, %v2398_v12  ;;  %v2729_v6 = vand.u32 4294901760, %v2194_v54  ;;  %v2730_v54 = vand.u32 4294901760, %v2199_v50 }
  0x9a   :  { %1049 = vmatpush.msra.mxu0 %v2725_v29  ;;  %1141 = vmatpush.msra.mxu2 %v2295_v63  ;;  %v2424_v29 = vand.u32 4294901760, %v82_v8  ;;  %v2435_v37 = vsub.f32 %v84_v43, %v2411_v47  ;;  %v1217_v28 = vand.u32 4294901760, %v1216_v62 }
  0x9b   :  { %1100 = vmatpush.msra.mxu1 %v2092_v39  ;;  %1188 = vmatpush.msra.mxu3 %v1187_v49  ;;  %v1210_v36 = vsub.f32 %v2358_v41, %v2726_v38  ;;  %v1205_v39 = vand.u32 4294901760, %v1204_v24  ;;  %v1227_v49 = vand.u32 4294901760, %v2396_v58  ;;  %v80_v38 = vld [vmem:[#allocation5 + $0x128] sm:$0xff]  ;;  %v1222_v24 = vsub.f32 %v2384_v7, %v1221_v23 }
  0x9c   :  { %1053 = vmatpush.msra.mxu0 %v2727_v19  ;;  %1143 = vmatpush.msra.mxu2 %v2299_v17  ;;  %v78_v19 = vld [vmem:[#allocation5 + $0x118] sm:$0xff]  ;;  %v2448_v43 = vsub.f32 %v82_v8, %v2424_v29  ;;  %v2731_v8 = vand.u32 4294901760, %v2211_v26  ;;  %v2732_v26 = vand.u32 4294901760, %v2230_v57 }
  0x9d   :  { %1102 = vmatpush.msra.mxu1 %v2099_v13  ;;  %1194 = vmatpush.msra.mxu3 %v1193_v56  ;;  %v1211_v13 = vand.u32 4294901760, %v1210_v36  ;;  %v1233_v56 = vand.u32 4294901760, %v2409_v10  ;;  %v1239_v36 = vand.u32 4294901760, %v2422_v5 }
  0x9e   :  { %1057 = vmatpush.msra.mxu0 %v2728_v9  ;;  %1145 = vmatpush.msra.mxu2 %v2312_v20  ;;  %v1245_v9 = vand.u32 4294901760, %v2435_v37 }
  0x9f   :  { %1104 = vmatpush.msra.mxu1 %v2106_v61  ;;  %1200 = vmatpush.msra.mxu3 %v1199_v14  ;;  %v2440_v61 = vand.u32 4294901760, %v80_v38  ;;  %v1228_v14 = vsub.f32 %v2396_v58, %v1227_v49  ;;  %v1234_v62 = vsub.f32 %v2409_v10, %v1233_v56 }
  0xa0   :  { %1061 = vmatpush.msra.mxu0 %v2729_v6  ;;  %1147 = vmatpush.msra.mxu2 %v2332_v51  ;;  %v76_v6 = vld [vmem:[#allocation5 + $0x108] sm:$0xff] }
  0xa1   :  { %1106 = vmatpush.msra.mxu1 %v2116_v31  ;;  %1206 = vmatpush.msra.mxu3 %v1205_v39  ;;  %v2453_v31 = vand.u32 4294901760, %v78_v19  ;;  %v1223_v39 = vand.u32 4294901760, %v1222_v24  ;;  %v1229_v50 = vand.u32 4294901760, %v1228_v14  ;;  %v1251_v24 = vand.u32 4294901760, %v2448_v43 }
  0xa2   :  { %1065 = vmatpush.msra.mxu0 %v2730_v54  ;;  %1149 = vmatpush.msra.mxu2 %v2347_v4  ;;  %v2471_v54 = vand.u32 4294901760, %v76_v6  ;;  %v2733_v14 = vand.u32 4294901760, %v2242_v48 }
  0xa3   :  { %1108 = vmatpush.msra.mxu1 %v2126_v18  ;;  %1212 = vmatpush.msra.mxu3 %v1211_v13  ;;  %v2464_v18 = vsub.f32 %v80_v38, %v2440_v61  ;;  %v1240_v13 = vsub.f32 %v2422_v5, %v1239_v36  ;;  %v1235_v38 = vand.u32 4294901760, %v1234_v62  ;;  %v2734_v62 = vand.u32 4294901760, %v2254_v35 }
  0xa4   :  { %1069 = vmatpush.msra.mxu0 %v2731_v8  ;;  %1151 = vmatpush.msra.mxu2 %v2360_v11  ;;  %v2735_v8 = vand.u32 4294901760, %v2268_v59 }
  0xa5   :  { %1110 = vmatpush.msra.mxu1 %v2137_v45  ;;  %1218 = vmatpush.msra.mxu3 %v1217_v28  ;;  %v2477_v45 = vsub.f32 %v78_v19, %v2453_v31  ;;  %v1246_v28 = vsub.f32 %v2435_v37, %v1245_v9  ;;  %v1257_v57 = vand.u32 4294901760, %v2464_v18  ;;  %v1252_v19 = vsub.f32 %v2448_v43, %v1251_v24 }
  0xa6   :  { %1073 = vmatpush.msra.mxu0 %v2732_v26  ;;  %1153 = vmatpush.msra.mxu2 %v2373_v60  ;;  %v2745_v26 = vld [vmem:[#allocation17_spill] sm:$0xff] }
  0xa7   :  { %1112 = vmatpush.msra.mxu1 %v2151_v22  ;;  %1224 = vmatpush.msra.mxu3 %v1223_v39  ;;  %v1241_v22 = vand.u32 4294901760, %v1240_v13  ;;  %v2492_v39 = vsub.f32 %v76_v6, %v2471_v54  ;;  %v1247_v48 = vand.u32 4294901760, %v1246_v28  ;;  %v1258_v6 = vsub.f32 %v2464_v18, %v1257_v57 }
  0xa8   :  { %1077 = vmatpush.msra.mxu0 %v2733_v14  ;;  %1155 = vmatpush.msra.mxu2 %v2386_v52  ;;  %v1253_v35 = vand.u32 4294901760, %v1252_v19 }
  0xa9   :  { %1114 = vmatpush.msra.mxu1 %v2164_v53  ;;  %1230 = vmatpush.msra.mxu3 %v1229_v50  ;;  %v1263_v53 = vand.u32 4294901760, %v2477_v45  ;;  %v2736_v50 = vand.u32 4294901760, %v2278_v27  ;;  %v1259_v13 = vand.u32 4294901760, %v1258_v6 }
  0xaa   :  { %1081 = vmatpush.msra.mxu0 %v2734_v62  ;;  %1157 = vmatpush.msra.mxu2 %v2398_v12 }
  0xab   :  { %1116 = vmatpush.msra.mxu1 %v2172_v25  ;;  %1236 = vmatpush.msra.mxu3 %v1235_v38  ;;  %v1269_v25 = vand.u32 4294901760, %v2492_v39  ;;  %v1264_v59 = vsub.f32 %v2477_v45, %v1263_v53  ;;  %v2747_v38 = vld [vmem:[#allocation14_spill] sm:$0xff] }
  0xac   :  { %1085 = vmatpush.msra.mxu0 %v2735_v8  ;;  %1159 = vmatpush.msra.mxu2 %v2411_v47 }
  0xad   :  { %1118 = vmatpush.msra.mxu1 %v2185_v15  ;;  %1242 = vmatpush.msra.mxu3 %v1241_v22  ;;  %v2737_v15 = vand.u32 4294901760, %v2293_v32  ;;  %v1265_v27 = vand.u32 4294901760, %v1264_v59  ;;  %v2738_v32 = vld [vmem:[#allocation13_spill] sm:$0xff] }
  0xae   :  { %1089 = vmatpush.msra.mxu0 %v2736_v50  ;;  %1161 = vmatpush.msra.mxu2 %v2424_v29 }
  0xaf   :  { %1120 = vmatpush.msra.mxu1 %v2205_v0  ;;  %1248 = vmatpush.msra.mxu3 %v1247_v48  ;;  %v1270_v0 = vsub.f32 %v2492_v39, %v1269_v25 }
  0xb0   :  { %1093 = vmatpush.msra.mxu0 %v2737_v15  ;;  %1163 = vmatpush.msra.mxu2 %v2440_v61 }
  0xb1   :  { %1122 = vmatpush.msra.mxu1 %v2217_v33  ;;  %1254 = vmatpush.msra.mxu3 %v1253_v35  ;;  %v1271_v33 = vand.u32 4294901760, %v1270_v0 }
  0xb2   :  { %832 = vmatmul.f32.vlgmr.msrb.gmra.mxu0 %v2004_v30  ;;  %1165 = vmatpush.msra.mxu2 %v2453_v31  ;;  %v2739_v30 = vand.u32 4294901760, %v2285_v2 }
  0xb3   :  { %1124 = vmatpush.msra.mxu1 %v2227_v55  ;;  %1280 = vmatpush.msrb.mxu0 %v2285_v2  ;;  %v2740_v55 = vld [vmem:[#allocation12_spill] sm:$0xff]  ;;  %v2743_v2 = vand.u32 4294901760, %v2320_v40 }
  0xb4   :  { %1260 = vmatpush.msra.mxu3 %v1259_v13  ;;  %987 = vmatmul.f32.vlgmr.msrb.gmra.mxu2 %v1942_v1  ;;  %v2741_v1 = vand.u32 4294901760, %v2307_v44 }
  0xb5   :  { %1283 = vmatpush.msrb.mxu0 %v2307_v44  ;;  %1126 = vmatpush.msra.mxu1 %v2239_v16  ;;  %v2742_v16 = vld [vmem:[#allocation11_spill] sm:$0xff]  ;;  %v2746_v44 = vand.u32 4294901760, %v2325_v21 }
  0xb6   :  { %1167 = vmatpush.msra.mxu2 %v2471_v54  ;;  %1266 = vmatpush.msra.mxu3 %v1265_v27 }
  0xb7   :  { %1026 = vmatmul.f32.vlgmr.msrb.gmra.mxu3 %v2738_v32  ;;  %1286 = vmatpush.msrb.mxu0 %v2320_v40  ;;  %v2748_v40 = vand.u32 4294901760, %v2340_v42 }
  0xb8   :  { %1374 = vmatpush.msrb.mxu2 %v2739_v30  ;;  %1128 = vmatpush.msra.mxu1 %v2250_v3  ;;  %v2744_v3 = vld [vmem:[#allocation18_spill] sm:$0xff] }
  0xb9   :  { %1272 = vmatpush.msra.mxu3 %v1271_v33  ;;  %933 = vmatmul.f32.vlgmr.msrb.gmra.mxu1 %v2740_v55 }
  0xba   :  { %1289 = vmatpush.msrb.mxu0 %v2325_v21  ;;  %1378 = vmatpush.msrb.mxu2 %v2741_v1  ;;  %v2749_v21 = vand.u32 4294901760, %v2358_v41 }
  0xbb   :  { %1441 = vmatpush.msrb.mxu3 %v2261_v46  ;;  %1130 = vmatpush.msra.mxu1 %v2742_v16 }
  0xbc   :  { %1292 = vmatpush.msrb.mxu0 %v2340_v42  ;;  %1382 = vmatpush.msrb.mxu2 %v2743_v2 }
  0xbd   :  { %1333 = vmatpush.msrb.mxu1 %v2261_v46  ;;  %1443 = vmatpush.msrb.mxu3 %v2744_v3 }
  0xbe   :  { %1173 = vmatmul.f32.vlgmr.msra.gmra.mxu2 %v2745_v26  ;;  %1295 = vmatpush.msrb.mxu0 %v2358_v41 }
  0xbf   :  { %1335 = vmatpush.msrb.mxu1 %v2744_v3  ;;  %1386 = vmatpush.msrb.mxu2 %v2746_v44 }
  0xc0   :  { %1445 = vmatpush.msrb.mxu3 %v2295_v63  ;;  %1095 = vmatmul.f32.vlgmr.msra.gmra.mxu0 %v2740_v55 }
  0xc1   :  { %1274 = vmatmul.f32.vlgmr.msra.gmra.mxu3 %v2747_v38  ;;  %1298 = vmatpush.msrb.mxu0 %v2371_v34 }
  0xc2   :  { %1337 = vmatpush.msrb.mxu1 %v2295_v63  ;;  %1390 = vmatpush.msrb.mxu2 %v2748_v40  ;;  %v2750_v63 = vand.u32 4294901760, %v2371_v34  ;;  %v2751_v34 = vld [vmem:[#allocation15_spill] sm:$0xff] }
  0xc3   :  { %1447 = vmatpush.msrb.mxu3 %v2299_v17  ;;  %1132 = vmatmul.f32.vlgmr.msra.gmra.mxu1 %v2740_v55 }
  0xc4   :  { %1301 = vmatpush.msrb.mxu0 %v2384_v7  ;;  %1339 = vmatpush.msrb.mxu1 %v2299_v17 }
  0xc5   :  { %1394 = vmatpush.msrb.mxu2 %v2749_v21  ;;  %1449 = vmatpush.msrb.mxu3 %v2312_v20 }
  0xc6   :  { %1304 = vmatpush.msrb.mxu0 %v2396_v58  ;;  %1341 = vmatpush.msrb.mxu1 %v2312_v20  ;;  %v151_v41 = vpop.f32.mrf.mxu0 }
  0xc7   :  { %1398 = vmatpush.msrb.mxu2 %v2750_v63  ;;  %1451 = vmatpush.msrb.mxu3 %v2332_v51 }
  0xc8   :  { %1307 = vmatpush.msrb.mxu0 %v2409_v10  ;;  %1343 = vmatpush.msrb.mxu1 %v2332_v51 }
  0xc9   :  { %1402 = vmatpush.msrb.mxu2 %v1221_v23  ;;  %1453 = vmatpush.msrb.mxu3 %v2347_v4 }
  0xca   :  { %1310 = vmatpush.msrb.mxu0 %v2422_v5  ;;  %1345 = vmatpush.msrb.mxu1 %v2347_v4 }
  0xcb   :  { %1406 = vmatpush.msrb.mxu2 %v1227_v49  ;;  %1455 = vmatpush.msrb.mxu3 %v2360_v11 }
  0xcc   :  { %1313 = vmatpush.msrb.mxu0 %v2435_v37  ;;  %1347 = vmatpush.msrb.mxu1 %v2360_v11 }
  0xcd   :  { %1410 = vmatpush.msrb.mxu2 %v1233_v56  ;;  %1457 = vmatpush.msrb.mxu3 %v2373_v60 }
  0xce   :  { %1316 = vmatpush.msrb.mxu0 %v2448_v43  ;;  %1349 = vmatpush.msrb.mxu1 %v2373_v60  ;;  %v2752_v60 = vld [vmem:[#allocation16_spill] sm:$0xff] }
  0xcf   :  { %1414 = vmatpush.msrb.mxu2 %v1239_v36  ;;  %1459 = vmatpush.msrb.mxu3 %v2386_v52 }
  0xd0   :  { %1319 = vmatpush.msrb.mxu0 %v2464_v18  ;;  %1351 = vmatpush.msrb.mxu1 %v2386_v52  ;;  %v252_v4 = vpop.f32.mrf.mxu1 }
  0xd1   :  { %1418 = vmatpush.msrb.mxu2 %v1245_v9  ;;  %1461 = vmatpush.msrb.mxu3 %v2398_v12  ;;  %v253_v10 = vadd.f32 %v252_v4, %v151_v41 }
  0xd2   :  { %1322 = vmatpush.msrb.mxu0 %v2477_v45  ;;  %1353 = vmatpush.msrb.mxu1 %v2398_v12  ;;  %v306_v11 = vpop.f32.mrf.mxu2  ;;  %v345_v20 = vpop.f32.mrf.mxu3 }
  0xd3   :  { %1422 = vmatpush.msrb.mxu2 %v1251_v24  ;;  %1463 = vmatpush.msrb.mxu3 %v2411_v47 }
  0xd4   :  { %1325 = vmatpush.msrb.mxu0 %v2492_v39  ;;  %1355 = vmatpush.msrb.mxu1 %v2411_v47 }
  0xd5   :  { %1426 = vmatpush.msrb.mxu2 %v1257_v57  ;;  %1465 = vmatpush.msrb.mxu3 %v2424_v29 }
  0xd6   :  { %1328 = vmatmul.f32.vlgmr.msrb.gmra.mxu0 %v2751_v34  ;;  %1357 = vmatpush.msrb.mxu1 %v2424_v29  ;;  %v307_v29 = vadd.f32 %v306_v11, %v253_v10 }
  0xd7   :  { %1430 = vmatpush.msrb.mxu2 %v1263_v53  ;;  %1467 = vmatpush.msrb.mxu3 %v2440_v61  ;;  %v414_v12 = vpop.f32.mrf.mxu0 }
  0xd8   :  { %1359 = vmatpush.msrb.mxu1 %v2440_v61  ;;  %v346_v61 = vadd.f32 %v345_v20, %v307_v29 }
  0xd9   :  { %1434 = vmatpush.msrb.mxu2 %v1269_v25  ;;  %1469 = vmatpush.msrb.mxu3 %v2453_v31 }
  0xda   :  { %1436 = vmatmul.f32.vlgmr.msrb.gmra.mxu2 %v2747_v38  ;;  %1361 = vmatpush.msrb.mxu1 %v2453_v31  ;;  %v451_v46 = vpop.f32.mrf.mxu1  ;;  %v415_v31 = vadd.f32 %v414_v12, %v346_v61 }
  0xdb   :  { %1471 = vmatpush.msrb.mxu3 %v2471_v54  ;;  %v492_v17 = vpop.f32.mrf.mxu2 }
  0xdc   :  { %1473 = vmatmul.f32.vlgmr.msrb.gmra.mxu3 %v2747_v38  ;;  %1363 = vmatpush.msrb.mxu1 %v2471_v54  ;;  %v452_v24 = vadd.f32 %v451_v46, %v415_v31 }
  0xdd   :  { %1367 = vmatmul.f32.vlgmr.msrb.gmra.mxu1 %v2752_v60 }
  0xde   :  { %v593_v51 = vpop.f32.mrf.mxu3  ;;  %v493_v28 = vadd.f32 %v492_v17, %v452_v24 }
  0xe0   :  { %v594_v22 = vadd.f32 %v593_v51, %v493_v28 }
  0xed   :  { %v647_v52 = vpop.f32.mrf.mxu0 }
  0xee   :  { %v648_v62 = vadd.f32 %v647_v52, %v594_v22 }
  0xf7   :  { %v686_v42 = vpop.f32.mrf.mxu1  ;;  %v755_v7 = vpop.f32.mrf.mxu2 }
  0xf8   :  { %v687_v48 = vadd.f32 %v686_v42, %v648_v62 }
  0xfa   :  { %v792_v58 = vpop.f32.mrf.mxu3  ;;  %v756_v25 = vadd.f32 %v755_v7, %v687_v48 }
  0xfc   :  { %v793_v13 = vadd.f32 %v792_v58, %v756_v25 }
 0x12f   :  { %v833_v47 = vpop.f32.mrf.mxu0 }
 0x136   :  { %v934_v23 = vpop.f32.mrf.mxu1 }
 0x137   :  { %v935_v49 = vadd.f32 %v934_v23, %v833_v47  ;;  %v988_v5 = vpop.f32.mrf.mxu2 }
 0x139   :  { %v989_v56 = vadd.f32 %v988_v5, %v935_v49 }
 0x13a   :  { %v1027_v37 = vpop.f32.mrf.mxu3 }
 0x13b   :  { %v1028_v36 = vadd.f32 %v1027_v37, %v989_v56 }
 0x13d   :  { %v1096_v43 = vpop.f32.mrf.mxu0 }
 0x13e   :  { %v1097_v9 = vadd.f32 %v1096_v43, %v1028_v36 }
 0x140   :  { %v1133_v18 = vpop.f32.mrf.mxu1 }
 0x141   :  { %v1134_v54 = vadd.f32 %v1133_v18, %v1097_v9  ;;  %v1174_v45 = vpop.f32.mrf.mxu2 }
 0x143   :  { %v1175_v14 = vadd.f32 %v1174_v45, %v1134_v54 }
 0x144   :  { %v1275_v57 = vpop.f32.mrf.mxu3 }
 0x145   :  { %v1276_v39 = vadd.f32 %v1275_v57, %v1175_v14 }
 0x153   :  { %v1329_v19 = vpop.f32.mrf.mxu0 }
 0x154   :  { %v1330_v53 = vadd.f32 %v1329_v19, %v1276_v39 }
 0x15a   :  { %v1368_v8 = vpop.f32.mrf.mxu1 }
 0x15b   :  { %v1369_v6 = vadd.f32 %v1368_v8, %v1330_v53 }
 0x15d   :  { %v1437_v35 = vpop.f32.mrf.mxu2 }
 0x15e   :  { %v1438_v50 = vadd.f32 %v1437_v35, %v1369_v6 }
 0x15f   :  { %v1474_v59 = vpop.f32.mrf.mxu3 }
 0x160   :  { %v1475_v15 = vadd.f32 %v1474_v59, %v1438_v50 }
 0x162   :  { %v1479_v0 = vrot.slane %v1475_v15, 6 }
 0x164   :  { %v1481_v27 = vsel %vm1480_vm0, %v793_v13, %v1479_v0 }
 0x165   :  { %1483 = vst [vmem:[#allocation7] sm:$0xf] %v1481_v27 }
 0x166   :  { %1494 = dma.vmem_to_hbm [thread:$0]  %s1490_s1, 64, %s1492_s23, [#allocation4]  }
 0x167   :  { %1583 = dma.done.wait [#allocation4], 64  }
 0x168   :  { %1584 = vsyncadd [#allocation4], 4294967232 }
 0x169   :  { %1499 = vsyncpa [#allocation3], 1 }
 0x16a   :  { %1500 = vsyncpa [#allocation6], 1 }
 0x16b   :  { %1501 = vsyncpa [#allocation4], 1 }

</bundles_post_ra>
